<compile_context>
chip_gen: v5e
topology: v5e:2x2
jax: 0.10.0
libtpu: 0.0.40
codegen_flags: <defaults>
</compile_context>

<pallas_src>
import jax
import jax.numpy as jnp
from jax.experimental import pallas as pl
from jax.experimental.pallas import tpu as pltpu


def _round_up(x, m):
    return ((x + m - 1) // m) * m


def _conv_pw_kernel(x_ref, w_ref, bias_ref, o_ref):
    # x_ref:    (tm, Cin)  activations (compute dtype, e.g. bf16)
    # w_ref:    (Cin, tn)  weight with BN scale folded in (compute dtype)
    # bias_ref: (1, tn)    folded BN bias (f32)
    # o_ref:    (tm, tn)
    acc = jnp.dot(x_ref[...], w_ref[...], preferred_element_type=jnp.float32)
    y = acc + bias_ref[...]                      # f32 epilogue
    o_ref[...] = jnp.maximum(y, 0.0).astype(o_ref.dtype)


def _pick_tn(cout, preferred):
    if cout % preferred == 0:
        return preferred
    if cout % 128 == 0:
        return 128
    return cout      # small / irregular channel count: use the full dim block


def conv_pw_bn_relu_flat(x_flat, weight, gamma, beta, running_mean,
                         running_var, eps=1e-5, *, tm=1024, tn=256,
                         compute_dtype=jnp.bfloat16, out_dtype=None):
    """Fused 1x1 conv + BN(eval) + ReLU on channel-last flattened activations.

    x_flat : (M, Cin)     activations (M = N*H*W)
    weight : (Cout, Cin)  Conv2d weight squeezed from (Cout, Cin, 1, 1)
    returns (M, Cout) in out_dtype (defaults to x_flat.dtype)
    """
    M, Cin = x_flat.shape
    Cout = weight.shape[0]
    if out_dtype is None:
        out_dtype = x_flat.dtype

    # Fold BN (eval mode) into per-output-channel scale/bias; fold the scale
    # into the weight columns so the kernel only does bias + ReLU.
    scale = (gamma / jnp.sqrt(running_var + eps)).astype(jnp.float32)
    bias = (beta - running_mean * scale).astype(jnp.float32)
    w_t = weight.astype(jnp.float32).T * scale[None, :]          # (Cin, Cout)

    x_c = x_flat.astype(compute_dtype)
    w_c = w_t.astype(compute_dtype)
    bias2d = bias.reshape(1, Cout)

    tm = min(tm, _round_up(M, 8))
    tn = min(_pick_tn(Cout, tn), Cout)
    grid = (pl.cdiv(M, tm), pl.cdiv(Cout, tn))

    in_bytes = jnp.dtype(compute_dtype).itemsize
    out_bytes = jnp.dtype(out_dtype).itemsize
    # Double-buffered blocks + headroom, clamped to fit v7x's 64 MiB VMEM.
    vmem_bytes = 2 * (tm * Cin * in_bytes + Cin * tn * in_bytes
                      + tn * 4 + tm * tn * out_bytes) + 4 * 2**20
    vmem_bytes = int(min(max(vmem_bytes, 16 * 2**20), 64 * 2**20))

    cost = pl.CostEstimate(
        flops=2 * M * Cin * Cout,
        transcendentals=0,
        bytes_accessed=(M * Cin * in_bytes + Cin * Cout * in_bytes
                        + Cout * 4 + M * Cout * out_bytes),
    )

    return pl.pallas_call(
        _conv_pw_kernel,
        out_shape=jax.ShapeDtypeStruct((M, Cout), out_dtype),
        grid_spec=pltpu.PrefetchScalarGridSpec(
            num_scalar_prefetch=0,
            grid=grid,
            in_specs=[
                pl.BlockSpec((tm, Cin), lambda i, j: (i, 0)),
                pl.BlockSpec((Cin, tn), lambda i, j: (0, j)),
                pl.BlockSpec((1, tn), lambda i, j: (0, j)),
            ],
            out_specs=pl.BlockSpec((tm, tn), lambda i, j: (i, j)),
        ),
        compiler_params=pltpu.CompilerParams(
            dimension_semantics=("parallel", "parallel"),
            vmem_limit_bytes=vmem_bytes,
        ),
        cost_estimate=cost,
    )(x_c, w_c, bias2d)


def conv_pw_bn_relu_nhwc(x_nhwc, weight, gamma, beta, running_mean,
                         running_var, eps=1e-5, **kw):
    """NHWC-in / NHWC-out path (preferred when chaining layers: no transposes)."""
    N, H, W, Cin = x_nhwc.shape
    Cout = weight.shape[0]
    out = conv_pw_bn_relu_flat(x_nhwc.reshape(N * H * W, Cin), weight, gamma,
                               beta, running_mean, running_var, eps, **kw)
    return out.reshape(N, H, W, Cout)


def conv_pw_forward(x_nchw, weight, gamma, beta, running_mean, running_var,
                    eps=1e-5, **kw):
    """NCHW wrapper matching the PyTorch conv_pw module interface."""
    out = conv_pw_bn_relu_nhwc(jnp.transpose(x_nchw, (0, 2, 3, 1)), weight,
                               gamma, beta, running_mean, running_var, eps,
                               **kw)
    return jnp.transpose(out, (0, 3, 1, 2))


def reference_forward(x_nchw, weight, gamma, beta, running_mean, running_var,
                      eps=1e-5):
    # Pure-JAX f32 reference: 1x1 conv == einsum over channels, BN(eval), ReLU.
    y = jnp.einsum('nchw,oc->nohw', x_nchw, weight)
    scale = gamma / jnp.sqrt(running_var + eps)
    bias = beta - running_mean * scale
    y = y * scale[None, :, None, None] + bias[None, :, None, None]
    return jnp.maximum(y, 0.0)


if __name__ == "__main__":
    def make_inputs(key, N, Cin, Cout, H, W):
        k_x, k_w, k_g, k_b, k_m, k_v = jax.random.split(key, 6)
        x = jax.random.normal(k_x, (N, Cin, H, W), dtype=jnp.float32)
        # Conv2d(inp, oup, 1, 1, 0, bias=False) weight is (oup, inp, 1, 1).
        weight = jax.random.normal(k_w, (Cout, Cin), dtype=jnp.float32) * 0.1
        gamma = 1.0 + 0.1 * jax.random.normal(k_g, (Cout,), dtype=jnp.float32)
        beta = 0.1 * jax.random.normal(k_b, (Cout,), dtype=jnp.float32)
        mean = 0.1 * jax.random.normal(k_m, (Cout,), dtype=jnp.float32)
        var = jnp.abs(1.0 + 0.1 * jax.random.normal(k_v, (Cout,),
                                                    dtype=jnp.float32))
        return x, weight, gamma, beta, mean, var

    fwd = jax.jit(conv_pw_forward)
    key = jax.random.PRNGKey(0)
    k1, k2 = jax.random.split(key)

    # (1) tiny early-layer-like shape (full-dim Cin/Cout blocks),
    # (2) later-layer-like shape with ragged M (= 2*7*7) and tn=256 tiling.
    configs = ((k1, (2, 4, 8, 16, 16)),
               (k2, (2, 128, 256, 7, 7)))
    for cfg_key, (N, Cin, Cout, H, W) in configs:
        args = make_inputs(cfg_key, N, Cin, Cout, H, W)
        out = jax.block_until_ready(fwd(*args))
        ref = reference_forward(*args)
        assert out.shape == (N, Cout, H, W)
        # bf16 compute on the MXU vs f32 reference -> bf16-level tolerance.
        assert jnp.allclose(out, ref, atol=2e-2, rtol=2e-2), (
            "max abs err", float(jnp.max(jnp.abs(out - ref))))

    print("KERNEL_OK")
</pallas_src>

<mosaic_0001>
module attributes {stable_mosaic.version = 11 : i64} {
  func.func @_conv_pw_kernel(%arg0: i32, %arg1: i32, %arg2: memref<512x4xbf16, #tpu.memory_space<vmem>>, %arg3: memref<4x8xbf16, #tpu.memory_space<vmem>>, %arg4: memref<1x8xf32, #tpu.memory_space<vmem>>, %arg5: memref<512x8xf32, #tpu.memory_space<vmem>>) attributes {dimension_semantics = [#tpu.dimension_semantics<parallel>, #tpu.dimension_semantics<parallel>], iteration_bounds = array<i64: 1, 1>, scalar_prefetch = 0 : i64, scratch_operands = 0 : i64, tpu.core_type = #tpu.core_type<tc>, window_params = [{transform_indices = @transform_0, window_bounds = array<i64: 512, 4>}, {transform_indices = @transform_1, window_bounds = array<i64: 4, 8>}, {transform_indices = @transform_2, window_bounds = array<i64: 1, 8>}, {transform_indices = @transform_3, window_bounds = array<i64: 512, 8>}]} {
    %c0 = arith.constant 0 : index
    %c0_0 = arith.constant 0 : index
    %0 = vector.load %arg2[%c0, %c0_0] : memref<512x4xbf16, #tpu.memory_space<vmem>>, vector<512x4xbf16>
    %c0_1 = arith.constant 0 : index
    %c0_2 = arith.constant 0 : index
    %1 = vector.load %arg3[%c0_1, %c0_2] : memref<4x8xbf16, #tpu.memory_space<vmem>>, vector<4x8xbf16>
    %cst = arith.constant dense<0.000000e+00> : vector<512x8xf32>
    %2 = tpu.matmul %0, %1, %cst {dimension_numbers = #tpu.dot_dimension_numbers<[1], [0], [0], [1], [0, 0, 1, 1], [], []>} : vector<512x4xbf16>, vector<4x8xbf16>, vector<512x8xf32> -> vector<512x8xf32>
    %c0_3 = arith.constant 0 : index
    %c0_4 = arith.constant 0 : index
    %3 = vector.load %arg4[%c0_3, %c0_4] : memref<1x8xf32, #tpu.memory_space<vmem>>, vector<1x8xf32>
    %4 = vector.broadcast %3 : vector<1x8xf32> to vector<512x8xf32>
    %5 = arith.addf %2, %4 : vector<512x8xf32>
    %cst_5 = arith.constant 0.000000e+00 : f32
    %6 = vector.broadcast %cst_5 : f32 to vector<512x8xf32>
    %7 = arith.maximumf %5, %6 : vector<512x8xf32>
    %c0_6 = arith.constant 0 : index
    %c0_7 = arith.constant 0 : index
    %8 = vector.load %arg5[%c0_6, %c0_7] : memref<512x8xf32, #tpu.memory_space<vmem>>, vector<512x8xf32>
    tpu.vector_store %arg5[%c0_6, %c0_7], %7 {strides = array<i32>} : memref<512x8xf32, #tpu.memory_space<vmem>>, vector<512x8xf32>,
    return
  }
  func.func @transform_0(%arg0: i32, %arg1: i32) -> (i32, i32) {
    %c0_i32 = arith.constant 0 : i32
    %c0_i32_0 = arith.constant 0 : i32
    return %arg0, %c0_i32 : i32, i32
  }
  func.func @transform_1(%arg0: i32, %arg1: i32) -> (i32, i32) {
    %c0_i32 = arith.constant 0 : i32
    %c0_i32_0 = arith.constant 0 : i32
    return %c0_i32, %arg1 : i32, i32
  }
  func.func @transform_2(%arg0: i32, %arg1: i32) -> (i32, i32) {
    %c0_i32 = arith.constant 0 : i32
    %c0_i32_0 = arith.constant 0 : i32
    return %c0_i32, %arg1 : i32, i32
  }
  func.func @transform_3(%arg0: i32, %arg1: i32) -> (i32, i32) {
    %c0_i32 = arith.constant 0 : i32
    return %arg0, %arg1 : i32, i32
  }
}

</mosaic_0001>

<bundles_post_ra>
// kernel: conv_pw_forward.1
= control target key start
LH: loop header
LB: loop body
LE: loop exit
PB: predicated region body
PF: predicated region fallthrough
CT: control target
= control target key end

     0   :  { %vm341_vm0 = vcmask 1041408   ;;  %vm244_vm1 = vcmask 31744   ;;  %vm578_vm2 = vcmask 64512   ;;  %s1319_s1 = inlined_call_operand.vmem [shape: bf16[4,8], index: 1, kind: input, shape index: {}]   ;;  %s1320_s0 = inlined_call_operand.vmem [shape: bf16[512,4], index: 0, kind: input, shape index: {}]   ;;  %s1321_s2 = inlined_call_operand.vmem [shape: f32[1,8], index: 2, kind: input, shape index: {}]   ;;  %s1322_s3 = inlined_call_operand.vmem [shape: f32[512,8], index: 3, kind: output, shape index: {}]  }
   0x1   :  { %v79_v0 = vld [vmem:[%s1319_s1] sm:$0x3]  ;;  %v808_v6 = vld [vmem:[%s1320_s0 + $0x8] sm:$0xff]  ;;  %v809_v10 = vld [vmem:[%s1320_s0 + $0x10] sm:$0xff] }
   0x2   :  { %v343_v1 = vsel %vm341_vm0, %v79_v0, 0  ;;  %v807_v2 = vld [vmem:[%s1320_s0] sm:$0xff]  ;;  %v816_v7 = vld [vmem:[%s1320_s0 + $0x48] sm:$0xff]  ;;  %v817_v11 = vld [vmem:[%s1320_s0 + $0x50] sm:$0xff] }
   0x3   :  { %v815_v3 = vld [vmem:[%s1320_s0 + $0x40] sm:$0xff]  ;;  %352 = vmatpush.bf16.msra.mxu0 %v343_v1  ;;  %839 = vmatpush.bf16.msra.mxu1 %v343_v1  ;;  %v824_v8 = vld [vmem:[%s1320_s0 + $0x88] sm:$0xff]  ;;  %v825_v12 = vld [vmem:[%s1320_s0 + $0x90] sm:$0xff] }
   0x4   :  { %v823_v4 = vld [vmem:[%s1320_s0 + $0x80] sm:$0xff]  ;;  %840 = vmatpush.bf16.msra.mxu2 %v343_v1  ;;  %841 = vmatpush.bf16.msra.mxu3 %v343_v1  ;;  %v832_v9 = vld [vmem:[%s1320_s0 + $0xc8] sm:$0xff]  ;;  %v833_v13 = vld [vmem:[%s1320_s0 + $0xd0] sm:$0xff] }
   0x5   :  { %v831_v5 = vld [vmem:[%s1320_s0 + $0xc0] sm:$0xff]  ;;  %v810_v14 = vld [vmem:[%s1320_s0 + $0x18] sm:$0xff]  ;;  %v812_v22 = vld [vmem:[%s1320_s0 + $0x28] sm:$0xff] }
   0x6   :  { %775 = vmatmul.msk.bf16.vlgmr.msra.gmra.mxu0 %vm244_vm1, %v807_v2  ;;  %783 = vmatmul.msk.bf16.vlgmr.msra.gmra.mxu1 %vm244_vm1, %v815_v3  ;;  %v818_v15 = vld [vmem:[%s1320_s0 + $0x58] sm:$0xff]  ;;  %v811_v18 = vld [vmem:[%s1320_s0 + $0x20] sm:$0xff]  ;;  %v820_v23 = vld [vmem:[%s1320_s0 + $0x68] sm:$0xff] }
   0x7   :  { %791 = vmatmul.msk.bf16.vlgmr.msra.gmra.mxu2 %vm244_vm1, %v823_v4  ;;  %799 = vmatmul.msk.bf16.vlgmr.msra.gmra.mxu3 %vm244_vm1, %v831_v5  ;;  %v826_v16 = vld [vmem:[%s1320_s0 + $0x98] sm:$0xff]  ;;  %v819_v19 = vld [vmem:[%s1320_s0 + $0x60] sm:$0xff]  ;;  %v828_v24 = vld [vmem:[%s1320_s0 + $0xa8] sm:$0xff] }
   0x8   :  { %v834_v17 = vld [vmem:[%s1320_s0 + $0xd8] sm:$0xff]  ;;  %v827_v20 = vld [vmem:[%s1320_s0 + $0xa0] sm:$0xff]  ;;  %v836_v25 = vld [vmem:[%s1320_s0 + $0xe8] sm:$0xff] }
   0x9   :  { %v835_v21 = vld [vmem:[%s1320_s0 + $0xe0] sm:$0xff]  ;;  %v813_v26 = vld [vmem:[%s1320_s0 + $0x30] sm:$0xff]  ;;  %v814_v30 = vld [vmem:[%s1320_s0 + $0x38] sm:$0xff] }
   0xa   :  { %v821_v27 = vld [vmem:[%s1320_s0 + $0x70] sm:$0xff]  ;;  %v822_v31 = vld [vmem:[%s1320_s0 + $0x78] sm:$0xff]  ;;  %v997_v34 = vld [vmem:[%s1321_s2] ss:$0 sm:$0xff] }
   0xb   :  { %v829_v28 = vld [vmem:[%s1320_s0 + $0xb0] sm:$0xff]  ;;  %v830_v32 = vld [vmem:[%s1320_s0 + $0xb8] sm:$0xff] }
   0xc   :  { %v837_v29 = vld [vmem:[%s1320_s0 + $0xf0] sm:$0xff]  ;;  %v838_v33 = vld [vmem:[%s1320_s0 + $0xf8] sm:$0xff] }
  0x16   :  { %776 = vmatmul.msk.bf16.gmra.mxu0 %vm244_vm1, %v808_v6  ;;  %784 = vmatmul.msk.bf16.gmra.mxu1 %vm244_vm1, %v816_v7 }
  0x17   :  { %792 = vmatmul.msk.bf16.gmra.mxu2 %vm244_vm1, %v824_v8  ;;  %800 = vmatmul.msk.bf16.gmra.mxu3 %vm244_vm1, %v832_v9 }
  0x26   :  { %777 = vmatmul.msk.bf16.gmra.mxu0 %vm244_vm1, %v809_v10  ;;  %785 = vmatmul.msk.bf16.gmra.mxu1 %vm244_vm1, %v817_v11 }
  0x27   :  { %793 = vmatmul.msk.bf16.gmra.mxu2 %vm244_vm1, %v825_v12  ;;  %801 = vmatmul.msk.bf16.gmra.mxu3 %vm244_vm1, %v833_v13 }
  0x36   :  { %778 = vmatmul.msk.bf16.gmra.mxu0 %vm244_vm1, %v810_v14  ;;  %786 = vmatmul.msk.bf16.gmra.mxu1 %vm244_vm1, %v818_v15 }
  0x37   :  { %794 = vmatmul.msk.bf16.gmra.mxu2 %vm244_vm1, %v826_v16  ;;  %802 = vmatmul.msk.bf16.gmra.mxu3 %vm244_vm1, %v834_v17 }
  0x46   :  { %779 = vmatmul.msk.bf16.gmra.mxu0 %vm244_vm1, %v811_v18  ;;  %787 = vmatmul.msk.bf16.gmra.mxu1 %vm244_vm1, %v819_v19 }
  0x47   :  { %795 = vmatmul.msk.bf16.gmra.mxu2 %vm244_vm1, %v827_v20  ;;  %803 = vmatmul.msk.bf16.gmra.mxu3 %vm244_vm1, %v835_v21 }
  0x56   :  { %780 = vmatmul.msk.bf16.gmra.mxu0 %vm244_vm1, %v812_v22  ;;  %788 = vmatmul.msk.bf16.gmra.mxu1 %vm244_vm1, %v820_v23 }
  0x57   :  { %796 = vmatmul.msk.bf16.gmra.mxu2 %vm244_vm1, %v828_v24  ;;  %804 = vmatmul.msk.bf16.gmra.mxu3 %vm244_vm1, %v836_v25 }
  0x66   :  { %781 = vmatmul.msk.bf16.gmra.mxu0 %vm244_vm1, %v813_v26  ;;  %789 = vmatmul.msk.bf16.gmra.mxu1 %vm244_vm1, %v821_v27 }
  0x67   :  { %797 = vmatmul.msk.bf16.gmra.mxu2 %vm244_vm1, %v829_v28  ;;  %805 = vmatmul.msk.bf16.gmra.mxu3 %vm244_vm1, %v837_v29 }
  0x76   :  { %782 = vmatmul.msk.bf16.gmra.mxu0 %vm244_vm1, %v814_v30  ;;  %790 = vmatmul.msk.bf16.gmra.mxu1 %vm244_vm1, %v822_v31 }
  0x77   :  { %798 = vmatmul.msk.bf16.gmra.mxu2 %vm244_vm1, %v830_v32  ;;  %806 = vmatmul.msk.bf16.gmra.mxu3 %vm244_vm1, %v838_v33 }
  0x83   :  { %v354_v35 = vpop.f32.mrf.mxu0  ;;  %v394_v36 = vpop.f32.mrf.mxu1 }
  0x84   :  { %v355_v37 = vadd.f32 %v997_v34, %v354_v35  ;;  %v395_v38 = vadd.f32 %v997_v34, %v394_v36 }
  0x86   :  { %v514_v39 = vmax.f32 %v355_v37, 0.0  ;;  %v530_v40 = vmax.f32 %v395_v38, 0.0 }
  0x88   :  { %579 = vst.msk [vmem:[%s1322_s3] sm:$0xff] %vm578_vm2, %v514_v39 }
  0x89   :  { %595 = vst.msk [vmem:[%s1322_s3 + $0x80] sm:$0xff] %vm578_vm2, %v530_v40 }
  0x8a   :  { %v434_v41 = vpop.f32.mrf.mxu2  ;;  %v474_v42 = vpop.f32.mrf.mxu3 }
  0x8b   :  { %v435_v43 = vadd.f32 %v997_v34, %v434_v41  ;;  %v475_v44 = vadd.f32 %v997_v34, %v474_v42  ;;  %v356_v45 = vpop.f32.mrf.mxu0  ;;  %v396_v46 = vpop.f32.mrf.mxu1 }
  0x8c   :  { %v357_v47 = vadd.f32 %v997_v34, %v356_v45  ;;  %v397_v48 = vadd.f32 %v997_v34, %v396_v46 }
  0x8d   :  { %v546_v49 = vmax.f32 %v435_v43, 0.0  ;;  %v562_v50 = vmax.f32 %v475_v44, 0.0 }
  0x8e   :  { %v515_v51 = vmax.f32 %v357_v47, 0.0  ;;  %v531_v52 = vmax.f32 %v397_v48, 0.0 }
  0x8f   :  { %611 = vst.msk [vmem:[%s1322_s3 + $0x100] sm:$0xff] %vm578_vm2, %v546_v49 }
  0x90   :  { %627 = vst.msk [vmem:[%s1322_s3 + $0x180] sm:$0xff] %vm578_vm2, %v562_v50 }
  0x91   :  { %580 = vst.msk [vmem:[%s1322_s3 + $0x8] sm:$0xff] %vm578_vm2, %v515_v51 }
  0x92   :  { %596 = vst.msk [vmem:[%s1322_s3 + $0x88] sm:$0xff] %vm578_vm2, %v531_v52  ;;  %v436_v53 = vpop.f32.mrf.mxu2  ;;  %v476_v54 = vpop.f32.mrf.mxu3 }
  0x93   :  { %v437_v55 = vadd.f32 %v997_v34, %v436_v53  ;;  %v477_v56 = vadd.f32 %v997_v34, %v476_v54  ;;  %v359_v57 = vpop.f32.mrf.mxu0  ;;  %v399_v58 = vpop.f32.mrf.mxu1 }
  0x94   :  { %v360_v59 = vadd.f32 %v997_v34, %v359_v57  ;;  %v400_v60 = vadd.f32 %v997_v34, %v399_v58 }
  0x95   :  { %v547_v61 = vmax.f32 %v437_v55, 0.0  ;;  %v563_v62 = vmax.f32 %v477_v56, 0.0 }
  0x96   :  { %v516_v63 = vmax.f32 %v360_v59, 0.0  ;;  %v532_v0 = vmax.f32 %v400_v60, 0.0 }
  0x97   :  { %612 = vst.msk [vmem:[%s1322_s3 + $0x108] sm:$0xff] %vm578_vm2, %v547_v61 }
  0x98   :  { %628 = vst.msk [vmem:[%s1322_s3 + $0x188] sm:$0xff] %vm578_vm2, %v563_v62 }
  0x99   :  { %581 = vst.msk [vmem:[%s1322_s3 + $0x10] sm:$0xff] %vm578_vm2, %v516_v63 }
  0x9a   :  { %597 = vst.msk [vmem:[%s1322_s3 + $0x90] sm:$0xff] %vm578_vm2, %v532_v0  ;;  %v439_v1 = vpop.f32.mrf.mxu2  ;;  %v479_v2 = vpop.f32.mrf.mxu3 }
  0x9b   :  { %v440_v3 = vadd.f32 %v997_v34, %v439_v1  ;;  %v480_v4 = vadd.f32 %v997_v34, %v479_v2  ;;  %v361_v5 = vpop.f32.mrf.mxu0  ;;  %v401_v6 = vpop.f32.mrf.mxu1 }
  0x9c   :  { %v362_v7 = vadd.f32 %v997_v34, %v361_v5  ;;  %v402_v8 = vadd.f32 %v997_v34, %v401_v6 }
  0x9d   :  { %v548_v9 = vmax.f32 %v440_v3, 0.0  ;;  %v564_v10 = vmax.f32 %v480_v4, 0.0 }
  0x9e   :  { %v517_v11 = vmax.f32 %v362_v7, 0.0  ;;  %v533_v12 = vmax.f32 %v402_v8, 0.0 }
  0x9f   :  { %613 = vst.msk [vmem:[%s1322_s3 + $0x110] sm:$0xff] %vm578_vm2, %v548_v9 }
  0xa0   :  { %629 = vst.msk [vmem:[%s1322_s3 + $0x190] sm:$0xff] %vm578_vm2, %v564_v10 }
  0xa1   :  { %582 = vst.msk [vmem:[%s1322_s3 + $0x18] sm:$0xff] %vm578_vm2, %v517_v11 }
  0xa2   :  { %598 = vst.msk [vmem:[%s1322_s3 + $0x98] sm:$0xff] %vm578_vm2, %v533_v12  ;;  %v441_v13 = vpop.f32.mrf.mxu2  ;;  %v481_v14 = vpop.f32.mrf.mxu3 }
  0xa3   :  { %v442_v15 = vadd.f32 %v997_v34, %v441_v13  ;;  %v482_v16 = vadd.f32 %v997_v34, %v481_v14  ;;  %v364_v17 = vpop.f32.mrf.mxu0  ;;  %v404_v18 = vpop.f32.mrf.mxu1 }
  0xa4   :  { %v365_v19 = vadd.f32 %v997_v34, %v364_v17  ;;  %v405_v20 = vadd.f32 %v997_v34, %v404_v18 }
  0xa5   :  { %v549_v21 = vmax.f32 %v442_v15, 0.0  ;;  %v565_v22 = vmax.f32 %v482_v16, 0.0 }
  0xa6   :  { %v518_v23 = vmax.f32 %v365_v19, 0.0  ;;  %v534_v24 = vmax.f32 %v405_v20, 0.0 }
  0xa7   :  { %614 = vst.msk [vmem:[%s1322_s3 + $0x118] sm:$0xff] %vm578_vm2, %v549_v21 }
  0xa8   :  { %630 = vst.msk [vmem:[%s1322_s3 + $0x198] sm:$0xff] %vm578_vm2, %v565_v22 }
  0xa9   :  { %583 = vst.msk [vmem:[%s1322_s3 + $0x20] sm:$0xff] %vm578_vm2, %v518_v23 }
  0xaa   :  { %599 = vst.msk [vmem:[%s1322_s3 + $0xa0] sm:$0xff] %vm578_vm2, %v534_v24  ;;  %v444_v25 = vpop.f32.mrf.mxu2  ;;  %v484_v26 = vpop.f32.mrf.mxu3 }
  0xab   :  { %v445_v27 = vadd.f32 %v997_v34, %v444_v25  ;;  %v485_v28 = vadd.f32 %v997_v34, %v484_v26  ;;  %v366_v29 = vpop.f32.mrf.mxu0  ;;  %v406_v30 = vpop.f32.mrf.mxu1 }
  0xac   :  { %v367_v31 = vadd.f32 %v997_v34, %v366_v29  ;;  %v407_v32 = vadd.f32 %v997_v34, %v406_v30 }
  0xad   :  { %v550_v33 = vmax.f32 %v445_v27, 0.0  ;;  %v566_v35 = vmax.f32 %v485_v28, 0.0 }
  0xae   :  { %v519_v36 = vmax.f32 %v367_v31, 0.0  ;;  %v535_v37 = vmax.f32 %v407_v32, 0.0 }
  0xaf   :  { %615 = vst.msk [vmem:[%s1322_s3 + $0x120] sm:$0xff] %vm578_vm2, %v550_v33 }
  0xb0   :  { %631 = vst.msk [vmem:[%s1322_s3 + $0x1a0] sm:$0xff] %vm578_vm2, %v566_v35 }
  0xb1   :  { %584 = vst.msk [vmem:[%s1322_s3 + $0x28] sm:$0xff] %vm578_vm2, %v519_v36 }
  0xb2   :  { %600 = vst.msk [vmem:[%s1322_s3 + $0xa8] sm:$0xff] %vm578_vm2, %v535_v37  ;;  %v446_v38 = vpop.f32.mrf.mxu2  ;;  %v486_v39 = vpop.f32.mrf.mxu3 }
  0xb3   :  { %v447_v40 = vadd.f32 %v997_v34, %v446_v38  ;;  %v487_v41 = vadd.f32 %v997_v34, %v486_v39  ;;  %v369_v42 = vpop.f32.mrf.mxu0  ;;  %v409_v43 = vpop.f32.mrf.mxu1 }
  0xb4   :  { %v370_v44 = vadd.f32 %v997_v34, %v369_v42  ;;  %v410_v45 = vadd.f32 %v997_v34, %v409_v43 }
  0xb5   :  { %v551_v46 = vmax.f32 %v447_v40, 0.0  ;;  %v567_v47 = vmax.f32 %v487_v41, 0.0 }
  0xb6   :  { %v520_v48 = vmax.f32 %v370_v44, 0.0  ;;  %v536_v49 = vmax.f32 %v410_v45, 0.0 }
  0xb7   :  { %616 = vst.msk [vmem:[%s1322_s3 + $0x128] sm:$0xff] %vm578_vm2, %v551_v46 }
  0xb8   :  { %632 = vst.msk [vmem:[%s1322_s3 + $0x1a8] sm:$0xff] %vm578_vm2, %v567_v47 }
  0xb9   :  { %585 = vst.msk [vmem:[%s1322_s3 + $0x30] sm:$0xff] %vm578_vm2, %v520_v48 }
  0xba   :  { %601 = vst.msk [vmem:[%s1322_s3 + $0xb0] sm:$0xff] %vm578_vm2, %v536_v49  ;;  %v449_v50 = vpop.f32.mrf.mxu2  ;;  %v489_v51 = vpop.f32.mrf.mxu3 }
  0xbb   :  { %v450_v52 = vadd.f32 %v997_v34, %v449_v50  ;;  %v490_v53 = vadd.f32 %v997_v34, %v489_v51  ;;  %v371_v54 = vpop.f32.mrf.mxu0  ;;  %v411_v55 = vpop.f32.mrf.mxu1 }
  0xbc   :  { %v372_v56 = vadd.f32 %v997_v34, %v371_v54  ;;  %v412_v57 = vadd.f32 %v997_v34, %v411_v55 }
  0xbd   :  { %v552_v58 = vmax.f32 %v450_v52, 0.0  ;;  %v568_v59 = vmax.f32 %v490_v53, 0.0 }
  0xbe   :  { %v521_v60 = vmax.f32 %v372_v56, 0.0  ;;  %v537_v61 = vmax.f32 %v412_v57, 0.0 }
  0xbf   :  { %617 = vst.msk [vmem:[%s1322_s3 + $0x130] sm:$0xff] %vm578_vm2, %v552_v58 }
  0xc0   :  { %633 = vst.msk [vmem:[%s1322_s3 + $0x1b0] sm:$0xff] %vm578_vm2, %v568_v59 }
  0xc1   :  { %586 = vst.msk [vmem:[%s1322_s3 + $0x38] sm:$0xff] %vm578_vm2, %v521_v60 }
  0xc2   :  { %602 = vst.msk [vmem:[%s1322_s3 + $0xb8] sm:$0xff] %vm578_vm2, %v537_v61  ;;  %v451_v62 = vpop.f32.mrf.mxu2  ;;  %v491_v63 = vpop.f32.mrf.mxu3 }
  0xc3   :  { %v452_v0 = vadd.f32 %v997_v34, %v451_v62  ;;  %v492_v1 = vadd.f32 %v997_v34, %v491_v63  ;;  %v374_v2 = vpop.f32.mrf.mxu0  ;;  %v414_v3 = vpop.f32.mrf.mxu1 }
  0xc4   :  { %v375_v4 = vadd.f32 %v997_v34, %v374_v2  ;;  %v415_v5 = vadd.f32 %v997_v34, %v414_v3 }
  0xc5   :  { %v553_v6 = vmax.f32 %v452_v0, 0.0  ;;  %v569_v7 = vmax.f32 %v492_v1, 0.0 }
  0xc6   :  { %v522_v8 = vmax.f32 %v375_v4, 0.0  ;;  %v538_v9 = vmax.f32 %v415_v5, 0.0 }
  0xc7   :  { %618 = vst.msk [vmem:[%s1322_s3 + $0x138] sm:$0xff] %vm578_vm2, %v553_v6 }
  0xc8   :  { %634 = vst.msk [vmem:[%s1322_s3 + $0x1b8] sm:$0xff] %vm578_vm2, %v569_v7 }
  0xc9   :  { %587 = vst.msk [vmem:[%s1322_s3 + $0x40] sm:$0xff] %vm578_vm2, %v522_v8 }
  0xca   :  { %603 = vst.msk [vmem:[%s1322_s3 + $0xc0] sm:$0xff] %vm578_vm2, %v538_v9  ;;  %v454_v10 = vpop.f32.mrf.mxu2  ;;  %v494_v11 = vpop.f32.mrf.mxu3 }
  0xcb   :  { %v455_v12 = vadd.f32 %v997_v34, %v454_v10  ;;  %v495_v13 = vadd.f32 %v997_v34, %v494_v11  ;;  %v376_v14 = vpop.f32.mrf.mxu0  ;;  %v416_v15 = vpop.f32.mrf.mxu1 }
  0xcc   :  { %v377_v16 = vadd.f32 %v997_v34, %v376_v14  ;;  %v417_v17 = vadd.f32 %v997_v34, %v416_v15 }
  0xcd   :  { %v554_v18 = vmax.f32 %v455_v12, 0.0  ;;  %v570_v19 = vmax.f32 %v495_v13, 0.0 }
  0xce   :  { %v523_v20 = vmax.f32 %v377_v16, 0.0  ;;  %v539_v21 = vmax.f32 %v417_v17, 0.0 }
  0xcf   :  { %619 = vst.msk [vmem:[%s1322_s3 + $0x140] sm:$0xff] %vm578_vm2, %v554_v18 }
  0xd0   :  { %635 = vst.msk [vmem:[%s1322_s3 + $0x1c0] sm:$0xff] %vm578_vm2, %v570_v19 }
  0xd1   :  { %588 = vst.msk [vmem:[%s1322_s3 + $0x48] sm:$0xff] %vm578_vm2, %v523_v20 }
  0xd2   :  { %604 = vst.msk [vmem:[%s1322_s3 + $0xc8] sm:$0xff] %vm578_vm2, %v539_v21  ;;  %v456_v22 = vpop.f32.mrf.mxu2  ;;  %v496_v23 = vpop.f32.mrf.mxu3 }
  0xd3   :  { %v457_v24 = vadd.f32 %v997_v34, %v456_v22  ;;  %v497_v25 = vadd.f32 %v997_v34, %v496_v23  ;;  %v379_v26 = vpop.f32.mrf.mxu0  ;;  %v419_v27 = vpop.f32.mrf.mxu1 }
  0xd4   :  { %v380_v28 = vadd.f32 %v997_v34, %v379_v26  ;;  %v420_v29 = vadd.f32 %v997_v34, %v419_v27 }
  0xd5   :  { %v555_v30 = vmax.f32 %v457_v24, 0.0  ;;  %v571_v31 = vmax.f32 %v497_v25, 0.0 }
  0xd6   :  { %v524_v32 = vmax.f32 %v380_v28, 0.0  ;;  %v540_v33 = vmax.f32 %v420_v29, 0.0 }
  0xd7   :  { %620 = vst.msk [vmem:[%s1322_s3 + $0x148] sm:$0xff] %vm578_vm2, %v555_v30 }
  0xd8   :  { %636 = vst.msk [vmem:[%s1322_s3 + $0x1c8] sm:$0xff] %vm578_vm2, %v571_v31 }
  0xd9   :  { %589 = vst.msk [vmem:[%s1322_s3 + $0x50] sm:$0xff] %vm578_vm2, %v524_v32 }
  0xda   :  { %605 = vst.msk [vmem:[%s1322_s3 + $0xd0] sm:$0xff] %vm578_vm2, %v540_v33  ;;  %v459_v35 = vpop.f32.mrf.mxu2  ;;  %v499_v36 = vpop.f32.mrf.mxu3 }
  0xdb   :  { %v460_v37 = vadd.f32 %v997_v34, %v459_v35  ;;  %v500_v38 = vadd.f32 %v997_v34, %v499_v36  ;;  %v381_v39 = vpop.f32.mrf.mxu0  ;;  %v421_v40 = vpop.f32.mrf.mxu1 }
  0xdc   :  { %v382_v41 = vadd.f32 %v997_v34, %v381_v39  ;;  %v422_v42 = vadd.f32 %v997_v34, %v421_v40 }
  0xdd   :  { %v556_v43 = vmax.f32 %v460_v37, 0.0  ;;  %v572_v44 = vmax.f32 %v500_v38, 0.0 }
  0xde   :  { %v525_v45 = vmax.f32 %v382_v41, 0.0  ;;  %v541_v46 = vmax.f32 %v422_v42, 0.0 }
  0xdf   :  { %621 = vst.msk [vmem:[%s1322_s3 + $0x150] sm:$0xff] %vm578_vm2, %v556_v43 }
  0xe0   :  { %637 = vst.msk [vmem:[%s1322_s3 + $0x1d0] sm:$0xff] %vm578_vm2, %v572_v44 }
  0xe1   :  { %590 = vst.msk [vmem:[%s1322_s3 + $0x58] sm:$0xff] %vm578_vm2, %v525_v45 }
  0xe2   :  { %606 = vst.msk [vmem:[%s1322_s3 + $0xd8] sm:$0xff] %vm578_vm2, %v541_v46  ;;  %v461_v47 = vpop.f32.mrf.mxu2  ;;  %v501_v48 = vpop.f32.mrf.mxu3 }
  0xe3   :  { %v462_v49 = vadd.f32 %v997_v34, %v461_v47  ;;  %v502_v50 = vadd.f32 %v997_v34, %v501_v48  ;;  %v384_v51 = vpop.f32.mrf.mxu0  ;;  %v424_v52 = vpop.f32.mrf.mxu1 }
  0xe4   :  { %v385_v53 = vadd.f32 %v997_v34, %v384_v51  ;;  %v425_v54 = vadd.f32 %v997_v34, %v424_v52 }
  0xe5   :  { %v557_v55 = vmax.f32 %v462_v49, 0.0  ;;  %v573_v56 = vmax.f32 %v502_v50, 0.0 }
  0xe6   :  { %v526_v57 = vmax.f32 %v385_v53, 0.0  ;;  %v542_v58 = vmax.f32 %v425_v54, 0.0 }
  0xe7   :  { %622 = vst.msk [vmem:[%s1322_s3 + $0x158] sm:$0xff] %vm578_vm2, %v557_v55 }
  0xe8   :  { %638 = vst.msk [vmem:[%s1322_s3 + $0x1d8] sm:$0xff] %vm578_vm2, %v573_v56 }
  0xe9   :  { %591 = vst.msk [vmem:[%s1322_s3 + $0x60] sm:$0xff] %vm578_vm2, %v526_v57 }
  0xea   :  { %607 = vst.msk [vmem:[%s1322_s3 + $0xe0] sm:$0xff] %vm578_vm2, %v542_v58  ;;  %v464_v59 = vpop.f32.mrf.mxu2  ;;  %v504_v60 = vpop.f32.mrf.mxu3 }
  0xeb   :  { %v465_v61 = vadd.f32 %v997_v34, %v464_v59  ;;  %v505_v62 = vadd.f32 %v997_v34, %v504_v60  ;;  %v386_v63 = vpop.f32.mrf.mxu0  ;;  %v426_v0 = vpop.f32.mrf.mxu1 }
  0xec   :  { %v387_v1 = vadd.f32 %v997_v34, %v386_v63  ;;  %v427_v2 = vadd.f32 %v997_v34, %v426_v0 }
  0xed   :  { %v558_v3 = vmax.f32 %v465_v61, 0.0  ;;  %v574_v4 = vmax.f32 %v505_v62, 0.0 }
  0xee   :  { %v527_v5 = vmax.f32 %v387_v1, 0.0  ;;  %v543_v6 = vmax.f32 %v427_v2, 0.0 }
  0xef   :  { %623 = vst.msk [vmem:[%s1322_s3 + $0x160] sm:$0xff] %vm578_vm2, %v558_v3 }
  0xf0   :  { %639 = vst.msk [vmem:[%s1322_s3 + $0x1e0] sm:$0xff] %vm578_vm2, %v574_v4 }
  0xf1   :  { %592 = vst.msk [vmem:[%s1322_s3 + $0x68] sm:$0xff] %vm578_vm2, %v527_v5 }
  0xf2   :  { %608 = vst.msk [vmem:[%s1322_s3 + $0xe8] sm:$0xff] %vm578_vm2, %v543_v6  ;;  %v466_v7 = vpop.f32.mrf.mxu2  ;;  %v506_v8 = vpop.f32.mrf.mxu3 }
  0xf3   :  { %v467_v9 = vadd.f32 %v997_v34, %v466_v7  ;;  %v507_v10 = vadd.f32 %v997_v34, %v506_v8  ;;  %v389_v11 = vpop.f32.mrf.mxu0  ;;  %v429_v12 = vpop.f32.mrf.mxu1 }
  0xf4   :  { %v390_v13 = vadd.f32 %v997_v34, %v389_v11  ;;  %v430_v14 = vadd.f32 %v997_v34, %v429_v12 }
  0xf5   :  { %v559_v15 = vmax.f32 %v467_v9, 0.0  ;;  %v575_v16 = vmax.f32 %v507_v10, 0.0 }
  0xf6   :  { %v528_v17 = vmax.f32 %v390_v13, 0.0  ;;  %v544_v18 = vmax.f32 %v430_v14, 0.0 }
  0xf7   :  { %624 = vst.msk [vmem:[%s1322_s3 + $0x168] sm:$0xff] %vm578_vm2, %v559_v15 }
  0xf8   :  { %640 = vst.msk [vmem:[%s1322_s3 + $0x1e8] sm:$0xff] %vm578_vm2, %v575_v16 }
  0xf9   :  { %593 = vst.msk [vmem:[%s1322_s3 + $0x70] sm:$0xff] %vm578_vm2, %v528_v17 }
  0xfa   :  { %609 = vst.msk [vmem:[%s1322_s3 + $0xf0] sm:$0xff] %vm578_vm2, %v544_v18  ;;  %v469_v19 = vpop.f32.mrf.mxu2  ;;  %v509_v20 = vpop.f32.mrf.mxu3 }
  0xfb   :  { %v470_v21 = vadd.f32 %v997_v34, %v469_v19  ;;  %v510_v22 = vadd.f32 %v997_v34, %v509_v20  ;;  %v391_v23 = vpop.f32.mrf.mxu0  ;;  %v431_v24 = vpop.f32.mrf.mxu1 }
  0xfc   :  { %v392_v25 = vadd.f32 %v997_v34, %v391_v23  ;;  %v432_v26 = vadd.f32 %v997_v34, %v431_v24 }
  0xfd   :  { %v560_v27 = vmax.f32 %v470_v21, 0.0  ;;  %v576_v28 = vmax.f32 %v510_v22, 0.0 }
  0xfe   :  { %v529_v29 = vmax.f32 %v392_v25, 0.0  ;;  %v545_v30 = vmax.f32 %v432_v26, 0.0 }
  0xff   :  { %625 = vst.msk [vmem:[%s1322_s3 + $0x170] sm:$0xff] %vm578_vm2, %v560_v27 }
 0x100   :  { %641 = vst.msk [vmem:[%s1322_s3 + $0x1f0] sm:$0xff] %vm578_vm2, %v576_v28 }
 0x101   :  { %594 = vst.msk [vmem:[%s1322_s3 + $0x78] sm:$0xff] %vm578_vm2, %v529_v29 }
 0x102   :  { %610 = vst.msk [vmem:[%s1322_s3 + $0xf8] sm:$0xff] %vm578_vm2, %v545_v30  ;;  %v471_v31 = vpop.f32.mrf.mxu2  ;;  %v511_v32 = vpop.f32.mrf.mxu3 }
 0x103   :  { %v472_v33 = vadd.f32 %v997_v34, %v471_v31  ;;  %v512_v35 = vadd.f32 %v997_v34, %v511_v32 }
 0x105   :  { %v561_v36 = vmax.f32 %v472_v33, 0.0  ;;  %v577_v37 = vmax.f32 %v512_v35, 0.0 }
 0x107   :  { %626 = vst.msk [vmem:[%s1322_s3 + $0x178] sm:$0xff] %vm578_vm2, %v561_v36 }
 0x108   :  { %642 = vst.msk [vmem:[%s1322_s3 + $0x1f8] sm:$0xff] %vm578_vm2, %v577_v37 }

</bundles_post_ra>
